<compile_context>
chip_gen: v7x
topology: tpu7x:2x2x1
jax: 0.10.0
libtpu: 0.0.40
codegen_flags: <defaults>
</compile_context>

<pallas_src>
import functools
import math

import jax
import jax.numpy as jnp
from jax.experimental import pallas as pl
from jax.experimental.pallas import tpu as pltpu

NUM_BITS = 8
QMAX = float(2 ** NUM_BITS - 1)


def _fq_from_stats(x, min_val, max_val):
    """FakeQuantize.forward with externally supplied global min/max stats.

    Mirrors the PyTorch spec exactly: qmin=0, qmax=2^bits-1, zero_point is NOT
    clamped (the custom autograd.Function in the spec does not clamp it), and
    min==max returns x unchanged.
    """
    scale = (max_val - min_val) / QMAX
    safe_scale = jnp.where(scale == 0.0, 1.0, scale)
    inv_scale = 1.0 / safe_scale                     # scalar; reused for quant & zp
    zero_point = -jnp.round(min_val * inv_scale)     # qmin == 0
    x_q = jnp.clip(jnp.round(x * inv_scale + zero_point), 0.0, QMAX)
    x_dq = (x_q - zero_point) * safe_scale
    return jnp.where(min_val == max_val, x, x_dq)


def _fake_quant(x):
    """FakeQuantize.forward: whole-tensor min/max affine fake-quant."""
    return _fq_from_stats(x, jnp.min(x), jnp.max(x))


def _actor_critic_kernel(x_ref, w1_ref, b1_ref, w23_ref, b23_ref, out_ref, *, n_actions):
    # ---- x = FakeQuantize(x) (activation-dependent -> stays in-kernel) ----
    x = x_ref[...]
    x = _fq_from_stats(x, jnp.min(x), jnp.max(x))

    # ---- shared: QuantizedLinear(input_dim, hidden) + QuantizedReLU ----
    # Weights/bias arrive already fake-quantized; default (single-pass bf16) MXU precision.
    h_pre = jnp.dot(x, w1_ref[...], preferred_element_type=jnp.float32) + b1_ref[...]
    mn = jnp.min(h_pre)
    mx = jnp.max(h_pre)
    h = _fq_from_stats(h_pre, mn, mx)
    # FakeQuantize and ReLU are monotone non-decreasing, so the post-ReLU tensor
    # stats follow exactly from the scalar stats: min/max(relu(fq(h))) =
    # max(0, fq(min/max(h))). Saves two whole-tensor reductions, bit-identical.
    mn_q = _fq_from_stats(mn, mn, mx)
    mx_q = _fq_from_stats(mx, mn, mx)
    hr = jnp.maximum(h, 0.0)
    hr = _fq_from_stats(hr, jnp.maximum(mn_q, 0.0), jnp.maximum(mx_q, 0.0))

    # ---- fused actor + critic linear: one MXU launch, one (B, n_actions+1) slab ----
    av = jnp.dot(hr, w23_ref[...], preferred_element_type=jnp.float32) + b23_ref[...]
    col = jax.lax.broadcasted_iota(jnp.int32, av.shape, 1)
    actor = col < n_actions            # columns [0, n_actions) = actor, last = critic

    # Per-head global min/max (masked so each head keeps its own quant stats).
    a_min = jnp.min(jnp.where(actor, av, jnp.inf))
    a_max = jnp.max(jnp.where(actor, av, -jnp.inf))
    v_min = jnp.min(jnp.where(actor, jnp.inf, av))
    v_max = jnp.max(jnp.where(actor, -jnp.inf, av))
    aq = _fq_from_stats(av, a_min, a_max)   # valid on actor columns (rest discarded)
    vq = _fq_from_stats(av, v_min, v_max)   # valid on the critic column (rest discarded)

    # ---- QuantizedSoftmax over the actor columns (EUP reciprocal, masked reduce) ----
    m = jnp.max(jnp.where(actor, aq, -jnp.inf), axis=-1, keepdims=True)
    e = jnp.where(actor, jnp.exp(aq - m), 0.0)
    denom = jnp.sum(e, axis=-1, keepdims=True)          # >= 1, always finite
    probs = e * pl.reciprocal(denom, approx=True)
    p_min = jnp.min(jnp.where(actor, probs, jnp.inf))
    p_max = jnp.max(jnp.where(actor, probs, -jnp.inf))
    probs = _fq_from_stats(probs, p_min, p_max)

    # Single lane-dense store: [action_probs | state_value].
    out_ref[...] = jnp.where(actor, probs, vq)


def quantized_actor_critic(x, params):
    """Full forward pass: weight-quant in the wrapper, activation chain in one Pallas program."""
    w1, b1, w2, b2, w3, b3 = params
    B, input_dim = x.shape
    hidden = w1.shape[0]
    n_actions = w2.shape[0]

    # Input-independent weight/bias fake-quant (per-tensor stats), done once here
    # instead of on the kernel's critical path. fq(b3) is an identity (1 element).
    w1q = _fake_quant(w1).T                                        # (input_dim, hidden)
    b1q = _fake_quant(b1).reshape(1, hidden)
    w23q = jnp.concatenate([_fake_quant(w2).T, _fake_quant(w3).T], axis=1)  # (hidden, n_actions+1)
    b23q = jnp.concatenate([_fake_quant(b2), _fake_quant(b3)]).reshape(1, n_actions + 1)

    inputs = (x.astype(jnp.float32), w1q, b1q, w23q, b23q)

    def full_spec(a):
        return pl.BlockSpec(a.shape, lambda i: (0,) * a.ndim)

    flops = 2 * B * (input_dim * hidden + hidden * (n_actions + 1))
    transcendentals = B * (n_actions + 2)
    bytes_accessed = 4 * (int(sum(a.size for a in inputs)) + B * (n_actions + 1))

    out = pl.pallas_call(
        functools.partial(_actor_critic_kernel, n_actions=n_actions),
        grid=(1,),
        in_specs=[full_spec(a) for a in inputs],
        out_specs=pl.BlockSpec((B, n_actions + 1), lambda i: (0, 0)),
        out_shape=jax.ShapeDtypeStruct((B, n_actions + 1), jnp.float32),
        compiler_params=pltpu.CompilerParams(dimension_semantics=("arbitrary",)),
        cost_estimate=pl.CostEstimate(
            flops=flops, transcendentals=transcendentals, bytes_accessed=bytes_accessed),
    )(*inputs)

    # Split the combined slab back into (probs, value) in the wrapper.
    return out[:, :n_actions], out[:, n_actions:]


def reference_forward(x, params):
    """Plain-JAX reference mirroring the PyTorch forward, for a sanity check."""
    w1, b1, w2, b2, w3, b3 = params
    xq = _fake_quant(x)
    h = _fake_quant(jnp.dot(xq, _fake_quant(w1).T) + _fake_quant(b1))
    h = _fake_quant(jnp.maximum(h, 0.0))
    a = _fake_quant(jnp.dot(h, _fake_quant(w2).T) + _fake_quant(b2))
    probs = _fake_quant(jax.nn.softmax(a, axis=-1))
    v = _fake_quant(jnp.dot(h, _fake_quant(w3).T) + _fake_quant(b3))
    return probs, v


def init_params(key, input_dim, n_actions, hidden_dim):
    """nn.Linear-style init: kaiming_uniform(a=sqrt(5)) -> U(-1/sqrt(fan_in), +)."""
    ks = jax.random.split(key, 6)

    def linear_init(kw, kb, in_f, out_f):
        bound = 1.0 / math.sqrt(in_f)
        w = jax.random.uniform(kw, (out_f, in_f), jnp.float32, -bound, bound)
        b = jax.random.uniform(kb, (out_f,), jnp.float32, -bound, bound)
        return w, b

    w1, b1 = linear_init(ks[0], ks[1], input_dim, hidden_dim)
    w2, b2 = linear_init(ks[2], ks[3], hidden_dim, n_actions)
    w3, b3 = linear_init(ks[4], ks[5], hidden_dim, 1)
    return (w1, b1, w2, b2, w3, b3)


if __name__ == "__main__":
    key = jax.random.PRNGKey(0)
    kx, kp = jax.random.split(key)

    B, input_dim, n_actions, hidden_dim = 2, 8, 4, 32
    x = jax.random.normal(kx, (B, input_dim), jnp.float32)
    params = init_params(kp, input_dim, n_actions, hidden_dim)

    probs, value = quantized_actor_critic(x, params)
    jax.block_until_ready((probs, value))

    assert probs.shape == (B, n_actions) and value.shape == (B, 1)
    assert bool(jnp.all(jnp.isfinite(probs))) and bool(jnp.all(jnp.isfinite(value)))

    # Loose tolerance: default-precision matmuls / approx reciprocal can shift a
    # value across an 8-bit quantization bin boundary.
    probs_ref, value_ref = reference_forward(x, params)
    assert jnp.allclose(probs, probs_ref, atol=5e-2), (probs, probs_ref)
    assert jnp.allclose(value, value_ref, atol=5e-2), (value, value_ref)

    # TODO(synk): `act()` (Categorical sampling + .item()) is host-side control flow,
    # not part of the tensor forward pass, so it is not implemented in the kernel.
    print("KERNEL_OK")
</pallas_src>

<mosaic_0001>
module attributes {stable_mosaic.version = 11 : i64} {
  func.func @_actor_critic_kernel(%arg0: i32, %arg1: memref<2x8xf32, #tpu.memory_space<vmem>>, %arg2: memref<8x32xf32, #tpu.memory_space<vmem>>, %arg3: memref<1x32xf32, #tpu.memory_space<vmem>>, %arg4: memref<32x5xf32, #tpu.memory_space<vmem>>, %arg5: memref<1x5xf32, #tpu.memory_space<vmem>>, %arg6: memref<2x5xf32, #tpu.memory_space<vmem>>) attributes {dimension_semantics = [#tpu.dimension_semantics<arbitrary>], iteration_bounds = array<i64: 1>, scalar_prefetch = 0 : i64, scratch_operands = 0 : i64, tpu.core_type = #tpu.core_type<tc>, window_params = [{pipeline_mode = #tpu.pipeline_mode<synchronous>, transform_indices = @transform_0, window_bounds = array<i64: 2, 8>}, {pipeline_mode = #tpu.pipeline_mode<synchronous>, transform_indices = @transform_1, window_bounds = array<i64: 8, 32>}, {pipeline_mode = #tpu.pipeline_mode<synchronous>, transform_indices = @transform_2, window_bounds = array<i64: 1, 32>}, {pipeline_mode = #tpu.pipeline_mode<synchronous>, transform_indices = @transform_3, window_bounds = array<i64: 32, 5>}, {pipeline_mode = #tpu.pipeline_mode<synchronous>, transform_indices = @transform_4, window_bounds = array<i64: 1, 5>}, {pipeline_mode = #tpu.pipeline_mode<synchronous>, transform_indices = @transform_5, window_bounds = array<i64: 2, 5>}]} {
    %c0 = arith.constant 0 : index
    %c0_0 = arith.constant 0 : index
    %0 = vector.load %arg1[%c0, %c0_0] : memref<2x8xf32, #tpu.memory_space<vmem>>, vector<2x8xf32>
    %1 = vector.shape_cast %0 : vector<2x8xf32> to vector<1x2x8xf32>
    %cst = arith.constant dense<0x7F800000> : vector<1xf32>
    %2 = vector.multi_reduction <minimumf>, %1, %cst [1, 2] : vector<1x2x8xf32> to vector<1xf32>
    %3 = vector.shape_cast %2 : vector<1xf32> to vector<1x1x1xf32>
    %4 = vector.extract %3[0, 0, 0] : f32 from vector<1x1x1xf32>
    %5 = vector.shape_cast %0 : vector<2x8xf32> to vector<1x2x8xf32>
    %cst_1 = arith.constant dense<0xFF800000> : vector<1xf32>
    %6 = vector.multi_reduction <maximumf>, %5, %cst_1 [1, 2] : vector<1x2x8xf32> to vector<1xf32>
    %7 = vector.shape_cast %6 : vector<1xf32> to vector<1x1x1xf32>
    %8 = vector.extract %7[0, 0, 0] : f32 from vector<1x1x1xf32>
    %9 = arith.subf %8, %4 : f32
    %cst_2 = arith.constant 2.550000e+02 : f32
    %10 = arith.divf %9, %cst_2 : f32
    %cst_3 = arith.constant 0.000000e+00 : f32
    %11 = arith.cmpf oeq, %10, %cst_3 : f32
    %cst_4 = arith.constant 1.000000e+00 : f32
    %12 = arith.select %11, %cst_4, %10 : f32
    %cst_5 = arith.constant 1.000000e+00 : f32
    %13 = arith.divf %cst_5, %12 : f32
    %14 = arith.mulf %4, %13 : f32
    %15 = math.roundeven %14 : f32
    %cst_6 = arith.constant 0.000000e+00 : f32
    %16 = arith.subf %cst_6, %15 : f32
    %17 = vector.broadcast %13 : f32 to vector<2x8xf32>
    %18 = arith.mulf %0, %17 : vector<2x8xf32>
    %19 = vector.broadcast %16 : f32 to vector<2x8xf32>
    %20 = arith.addf %18, %19 : vector<2x8xf32>
    %21 = math.roundeven %20 : vector<2x8xf32>
    %cst_7 = arith.constant 0.000000e+00 : f32
    %cst_8 = arith.constant 2.550000e+02 : f32
    %22 = vector.broadcast %cst_7 : f32 to vector<2x8xf32>
    %23 = arith.maximumf %22, %21 : vector<2x8xf32>
    %24 = vector.broadcast %cst_8 : f32 to vector<2x8xf32>
    %25 = arith.minimumf %24, %23 : vector<2x8xf32>
    %26 = vector.broadcast %16 : f32 to vector<2x8xf32>
    %27 = arith.subf %25, %26 : vector<2x8xf32>
    %28 = vector.broadcast %12 : f32 to vector<2x8xf32>
    %29 = arith.mulf %27, %28 : vector<2x8xf32>
    %30 = arith.cmpf oeq, %4, %8 : f32
    %31 = arith.select %30, %0, %29 : vector<2x8xf32>
    %c0_9 = arith.constant 0 : index
    %c0_10 = arith.constant 0 : index
    %32 = vector.load %arg2[%c0_9, %c0_10] : memref<8x32xf32, #tpu.memory_space<vmem>>, vector<8x32xf32>
    %cst_11 = arith.constant dense<0.000000e+00> : vector<2x32xf32>
    %33 = tpu.matmul %31, %32, %cst_11 {dimension_numbers = #tpu.dot_dimension_numbers<[1], [0], [0], [1], [0, 0, 1, 1], [], []>} : vector<2x8xf32>, vector<8x32xf32>, vector<2x32xf32> -> vector<2x32xf32>
    %c0_12 = arith.constant 0 : index
    %c0_13 = arith.constant 0 : index
    %34 = vector.load %arg3[%c0_12, %c0_13] : memref<1x32xf32, #tpu.memory_space<vmem>>, vector<1x32xf32>
    %35 = vector.broadcast %34 : vector<1x32xf32> to vector<2x32xf32>
    %36 = arith.addf %33, %35 : vector<2x32xf32>
    %37 = vector.shape_cast %36 : vector<2x32xf32> to vector<1x2x32xf32>
    %cst_14 = arith.constant dense<0x7F800000> : vector<1xf32>
    %38 = vector.multi_reduction <minimumf>, %37, %cst_14 [1, 2] : vector<1x2x32xf32> to vector<1xf32>
    %39 = vector.shape_cast %38 : vector<1xf32> to vector<1x1x1xf32>
    %40 = vector.extract %39[0, 0, 0] : f32 from vector<1x1x1xf32>
    %41 = vector.shape_cast %36 : vector<2x32xf32> to vector<1x2x32xf32>
    %cst_15 = arith.constant dense<0xFF800000> : vector<1xf32>
    %42 = vector.multi_reduction <maximumf>, %41, %cst_15 [1, 2] : vector<1x2x32xf32> to vector<1xf32>
    %43 = vector.shape_cast %42 : vector<1xf32> to vector<1x1x1xf32>
    %44 = vector.extract %43[0, 0, 0] : f32 from vector<1x1x1xf32>
    %45 = arith.subf %44, %40 : f32
    %cst_16 = arith.constant 2.550000e+02 : f32
    %46 = arith.divf %45, %cst_16 : f32
    %cst_17 = arith.constant 0.000000e+00 : f32
    %47 = arith.cmpf oeq, %46, %cst_17 : f32
    %cst_18 = arith.constant 1.000000e+00 : f32
    %48 = arith.select %47, %cst_18, %46 : f32
    %cst_19 = arith.constant 1.000000e+00 : f32
    %49 = arith.divf %cst_19, %48 : f32
    %50 = arith.mulf %40, %49 : f32
    %51 = math.roundeven %50 : f32
    %cst_20 = arith.constant 0.000000e+00 : f32
    %52 = arith.subf %cst_20, %51 : f32
    %53 = vector.broadcast %49 : f32 to vector<2x32xf32>
    %54 = arith.mulf %36, %53 : vector<2x32xf32>
    %55 = vector.broadcast %52 : f32 to vector<2x32xf32>
    %56 = arith.addf %54, %55 : vector<2x32xf32>
    %57 = math.roundeven %56 : vector<2x32xf32>
    %cst_21 = arith.constant 0.000000e+00 : f32
    %cst_22 = arith.constant 2.550000e+02 : f32
    %58 = vector.broadcast %cst_21 : f32 to vector<2x32xf32>
    %59 = arith.maximumf %58, %57 : vector<2x32xf32>
    %60 = vector.broadcast %cst_22 : f32 to vector<2x32xf32>
    %61 = arith.minimumf %60, %59 : vector<2x32xf32>
    %62 = vector.broadcast %52 : f32 to vector<2x32xf32>
    %63 = arith.subf %61, %62 : vector<2x32xf32>
    %64 = vector.broadcast %48 : f32 to vector<2x32xf32>
    %65 = arith.mulf %63, %64 : vector<2x32xf32>
    %66 = arith.cmpf oeq, %40, %44 : f32
    %67 = arith.select %66, %36, %65 : vector<2x32xf32>
    %68 = arith.subf %44, %40 : f32
    %cst_23 = arith.constant 2.550000e+02 : f32
    %69 = arith.divf %68, %cst_23 : f32
    %cst_24 = arith.constant 0.000000e+00 : f32
    %70 = arith.cmpf oeq, %69, %cst_24 : f32
    %cst_25 = arith.constant 1.000000e+00 : f32
    %71 = arith.select %70, %cst_25, %69 : f32
    %cst_26 = arith.constant 1.000000e+00 : f32
    %72 = arith.divf %cst_26, %71 : f32
    %73 = arith.mulf %40, %72 : f32
    %74 = math.roundeven %73 : f32
    %cst_27 = arith.constant 0.000000e+00 : f32
    %75 = arith.subf %cst_27, %74 : f32
    %76 = arith.mulf %40, %72 : f32
    %77 = arith.addf %76, %75 : f32
    %78 = math.roundeven %77 : f32
    %cst_28 = arith.constant 0.000000e+00 : f32
    %cst_29 = arith.constant 2.550000e+02 : f32
    %79 = arith.maximumf %cst_28, %78 : f32
    %80 = arith.minimumf %cst_29, %79 : f32
    %81 = arith.subf %80, %75 : f32
    %82 = arith.mulf %81, %71 : f32
    %83 = arith.cmpf oeq, %40, %44 : f32
    %84 = arith.select %83, %40, %82 : f32
    %85 = arith.subf %44, %40 : f32
    %cst_30 = arith.constant 2.550000e+02 : f32
    %86 = arith.divf %85, %cst_30 : f32
    %cst_31 = arith.constant 0.000000e+00 : f32
    %87 = arith.cmpf oeq, %86, %cst_31 : f32
    %cst_32 = arith.constant 1.000000e+00 : f32
    %88 = arith.select %87, %cst_32, %86 : f32
    %cst_33 = arith.constant 1.000000e+00 : f32
    %89 = arith.divf %cst_33, %88 : f32
    %90 = arith.mulf %40, %89 : f32
    %91 = math.roundeven %90 : f32
    %cst_34 = arith.constant 0.000000e+00 : f32
    %92 = arith.subf %cst_34, %91 : f32
    %93 = arith.mulf %44, %89 : f32
    %94 = arith.addf %93, %92 : f32
    %95 = math.roundeven %94 : f32
    %cst_35 = arith.constant 0.000000e+00 : f32
    %cst_36 = arith.constant 2.550000e+02 : f32
    %96 = arith.maximumf %cst_35, %95 : f32
    %97 = arith.minimumf %cst_36, %96 : f32
    %98 = arith.subf %97, %92 : f32
    %99 = arith.mulf %98, %88 : f32
    %100 = arith.cmpf oeq, %40, %44 : f32
    %101 = arith.select %100, %44, %99 : f32
    %cst_37 = arith.constant 0.000000e+00 : f32
    %102 = vector.broadcast %cst_37 : f32 to vector<2x32xf32>
    %103 = arith.maximumf %67, %102 : vector<2x32xf32>
    %cst_38 = arith.constant 0.000000e+00 : f32
    %104 = arith.maximumf %84, %cst_38 : f32
    %cst_39 = arith.constant 0.000000e+00 : f32
    %105 = arith.maximumf %101, %cst_39 : f32
    %106 = arith.subf %105, %104 : f32
    %cst_40 = arith.constant 2.550000e+02 : f32
    %107 = arith.divf %106, %cst_40 : f32
    %cst_41 = arith.constant 0.000000e+00 : f32
    %108 = arith.cmpf oeq, %107, %cst_41 : f32
    %cst_42 = arith.constant 1.000000e+00 : f32
    %109 = arith.select %108, %cst_42, %107 : f32
    %cst_43 = arith.constant 1.000000e+00 : f32
    %110 = arith.divf %cst_43, %109 : f32
    %111 = arith.mulf %104, %110 : f32
    %112 = math.roundeven %111 : f32
    %cst_44 = arith.constant 0.000000e+00 : f32
    %113 = arith.subf %cst_44, %112 : f32
    %114 = vector.broadcast %110 : f32 to vector<2x32xf32>
    %115 = arith.mulf %103, %114 : vector<2x32xf32>
    %116 = vector.broadcast %113 : f32 to vector<2x32xf32>
    %117 = arith.addf %115, %116 : vector<2x32xf32>
    %118 = math.roundeven %117 : vector<2x32xf32>
    %cst_45 = arith.constant 0.000000e+00 : f32
    %cst_46 = arith.constant 2.550000e+02 : f32
    %119 = vector.broadcast %cst_45 : f32 to vector<2x32xf32>
    %120 = arith.maximumf %119, %118 : vector<2x32xf32>
    %121 = vector.broadcast %cst_46 : f32 to vector<2x32xf32>
    %122 = arith.minimumf %121, %120 : vector<2x32xf32>
    %123 = vector.broadcast %113 : f32 to vector<2x32xf32>
    %124 = arith.subf %122, %123 : vector<2x32xf32>
    %125 = vector.broadcast %109 : f32 to vector<2x32xf32>
    %126 = arith.mulf %124, %125 : vector<2x32xf32>
    %127 = arith.cmpf oeq, %104, %105 : f32
    %128 = arith.select %127, %103, %126 : vector<2x32xf32>
    %c0_47 = arith.constant 0 : index
    %c0_48 = arith.constant 0 : index
    %129 = vector.load %arg4[%c0_47, %c0_48] : memref<32x5xf32, #tpu.memory_space<vmem>>, vector<32x5xf32>
    %cst_49 = arith.constant dense<0.000000e+00> : vector<2x5xf32>
    %130 = tpu.matmul %128, %129, %cst_49 {dimension_numbers = #tpu.dot_dimension_numbers<[1], [0], [0], [1], [0, 0, 1, 1], [], []>} : vector<2x32xf32>, vector<32x5xf32>, vector<2x5xf32> -> vector<2x5xf32>
    %c0_50 = arith.constant 0 : index
    %c0_51 = arith.constant 0 : index
    %131 = vector.load %arg5[%c0_50, %c0_51] : memref<1x5xf32, #tpu.memory_space<vmem>>, vector<1x5xf32>
    %132 = vector.broadcast %131 : vector<1x5xf32> to vector<2x5xf32>
    %133 = arith.addf %130, %132 : vector<2x5xf32>
    %134 = tpu.iota {dimensions = array<i32: 1>} : vector<2x5xi32>
    %c4_i32 = arith.constant 4 : i32
    %135 = vector.broadcast %c4_i32 : i32 to vector<2x5xi32>
    %136 = arith.cmpi slt, %134, %135 : vector<2x5xi32>
    %cst_52 = arith.constant 0x7F800000 : f32
    %137 = vector.broadcast %cst_52 : f32 to vector<2x5xf32>
    %138 = arith.select %136, %133, %137 : vector<2x5xi1>, vector<2x5xf32>
    %139 = vector.shape_cast %138 : vector<2x5xf32> to vector<1x2x5xf32>
    %cst_53 = arith.constant dense<0x7F800000> : vector<1xf32>
    %140 = vector.multi_reduction <minimumf>, %139, %cst_53 [1, 2] : vector<1x2x5xf32> to vector<1xf32>
    %141 = vector.shape_cast %140 : vector<1xf32> to vector<1x1x1xf32>
    %142 = vector.extract %141[0, 0, 0] : f32 from vector<1x1x1xf32>
    %cst_54 = arith.constant 0xFF800000 : f32
    %143 = vector.broadcast %cst_54 : f32 to vector<2x5xf32>
    %144 = arith.select %136, %133, %143 : vector<2x5xi1>, vector<2x5xf32>
    %145 = vector.shape_cast %144 : vector<2x5xf32> to vector<1x2x5xf32>
    %cst_55 = arith.constant dense<0xFF800000> : vector<1xf32>
    %146 = vector.multi_reduction <maximumf>, %145, %cst_55 [1, 2] : vector<1x2x5xf32> to vector<1xf32>
    %147 = vector.shape_cast %146 : vector<1xf32> to vector<1x1x1xf32>
    %148 = vector.extract %147[0, 0, 0] : f32 from vector<1x1x1xf32>
    %cst_56 = arith.constant 0x7F800000 : f32
    %149 = vector.broadcast %cst_56 : f32 to vector<2x5xf32>
    %150 = arith.select %136, %149, %133 : vector<2x5xi1>, vector<2x5xf32>
    %151 = vector.shape_cast %150 : vector<2x5xf32> to vector<1x2x5xf32>
    %cst_57 = arith.constant dense<0x7F800000> : vector<1xf32>
    %152 = vector.multi_reduction <minimumf>, %151, %cst_57 [1, 2] : vector<1x2x5xf32> to vector<1xf32>
    %153 = vector.shape_cast %152 : vector<1xf32> to vector<1x1x1xf32>
    %154 = vector.extract %153[0, 0, 0] : f32 from vector<1x1x1xf32>
    %cst_58 = arith.constant 0xFF800000 : f32
    %155 = vector.broadcast %cst_58 : f32 to vector<2x5xf32>
    %156 = arith.select %136, %155, %133 : vector<2x5xi1>, vector<2x5xf32>
    %157 = vector.shape_cast %156 : vector<2x5xf32> to vector<1x2x5xf32>
    %cst_59 = arith.constant dense<0xFF800000> : vector<1xf32>
    %158 = vector.multi_reduction <maximumf>, %157, %cst_59 [1, 2] : vector<1x2x5xf32> to vector<1xf32>
    %159 = vector.shape_cast %158 : vector<1xf32> to vector<1x1x1xf32>
    %160 = vector.extract %159[0, 0, 0] : f32 from vector<1x1x1xf32>
    %161 = arith.subf %148, %142 : f32
    %cst_60 = arith.constant 2.550000e+02 : f32
    %162 = arith.divf %161, %cst_60 : f32
    %cst_61 = arith.constant 0.000000e+00 : f32
    %163 = arith.cmpf oeq, %162, %cst_61 : f32
    %cst_62 = arith.constant 1.000000e+00 : f32
    %164 = arith.select %163, %cst_62, %162 : f32
    %cst_63 = arith.constant 1.000000e+00 : f32
    %165 = arith.divf %cst_63, %164 : f32
    %166 = arith.mulf %142, %165 : f32
    %167 = math.roundeven %166 : f32
    %cst_64 = arith.constant 0.000000e+00 : f32
    %168 = arith.subf %cst_64, %167 : f32
    %169 = vector.broadcast %165 : f32 to vector<2x5xf32>
    %170 = arith.mulf %133, %169 : vector<2x5xf32>
    %171 = vector.broadcast %168 : f32 to vector<2x5xf32>
    %172 = arith.addf %170, %171 : vector<2x5xf32>
    %173 = math.roundeven %172 : vector<2x5xf32>
    %cst_65 = arith.constant 0.000000e+00 : f32
    %cst_66 = arith.constant 2.550000e+02 : f32
    %174 = vector.broadcast %cst_65 : f32 to vector<2x5xf32>
    %175 = arith.maximumf %174, %173 : vector<2x5xf32>
    %176 = vector.broadcast %cst_66 : f32 to vector<2x5xf32>
    %177 = arith.minimumf %176, %175 : vector<2x5xf32>
    %178 = vector.broadcast %168 : f32 to vector<2x5xf32>
    %179 = arith.subf %177, %178 : vector<2x5xf32>
    %180 = vector.broadcast %164 : f32 to vector<2x5xf32>
    %181 = arith.mulf %179, %180 : vector<2x5xf32>
    %182 = arith.cmpf oeq, %142, %148 : f32
    %183 = arith.select %182, %133, %181 : vector<2x5xf32>
    %184 = arith.subf %160, %154 : f32
    %cst_67 = arith.constant 2.550000e+02 : f32
    %185 = arith.divf %184, %cst_67 : f32
    %cst_68 = arith.constant 0.000000e+00 : f32
    %186 = arith.cmpf oeq, %185, %cst_68 : f32
    %cst_69 = arith.constant 1.000000e+00 : f32
    %187 = arith.select %186, %cst_69, %185 : f32
    %cst_70 = arith.constant 1.000000e+00 : f32
    %188 = arith.divf %cst_70, %187 : f32
    %189 = arith.mulf %154, %188 : f32
    %190 = math.roundeven %189 : f32
    %cst_71 = arith.constant 0.000000e+00 : f32
    %191 = arith.subf %cst_71, %190 : f32
    %192 = vector.broadcast %188 : f32 to vector<2x5xf32>
    %193 = arith.mulf %133, %192 : vector<2x5xf32>
    %194 = vector.broadcast %191 : f32 to vector<2x5xf32>
    %195 = arith.addf %193, %194 : vector<2x5xf32>
    %196 = math.roundeven %195 : vector<2x5xf32>
    %cst_72 = arith.constant 0.000000e+00 : f32
    %cst_73 = arith.constant 2.550000e+02 : f32
    %197 = vector.broadcast %cst_72 : f32 to vector<2x5xf32>
    %198 = arith.maximumf %197, %196 : vector<2x5xf32>
    %199 = vector.broadcast %cst_73 : f32 to vector<2x5xf32>
    %200 = arith.minimumf %199, %198 : vector<2x5xf32>
    %201 = vector.broadcast %191 : f32 to vector<2x5xf32>
    %202 = arith.subf %200, %201 : vector<2x5xf32>
    %203 = vector.broadcast %187 : f32 to vector<2x5xf32>
    %204 = arith.mulf %202, %203 : vector<2x5xf32>
    %205 = arith.cmpf oeq, %154, %160 : f32
    %206 = arith.select %205, %133, %204 : vector<2x5xf32>
    %cst_74 = arith.constant 0xFF800000 : f32
    %207 = vector.broadcast %cst_74 : f32 to vector<2x5xf32>
    %208 = arith.select %136, %183, %207 : vector<2x5xi1>, vector<2x5xf32>
    %cst_75 = arith.constant dense<0xFF800000> : vector<2xf32>
    %209 = vector.multi_reduction <maximumf>, %208, %cst_75 [1] : vector<2x5xf32> to vector<2xf32>
    %210 = vector.shape_cast %209 : vector<2xf32> to vector<2x1xf32>
    %211 = vector.broadcast %210 : vector<2x1xf32> to vector<2x5xf32>
    %212 = arith.subf %183, %211 : vector<2x5xf32>
    %213 = math.exp %212 : vector<2x5xf32>
    %cst_76 = arith.constant 0.000000e+00 : f32
    %214 = vector.broadcast %cst_76 : f32 to vector<2x5xf32>
    %215 = arith.select %136, %213, %214 : vector<2x5xi1>, vector<2x5xf32>
    %cst_77 = arith.constant dense<0.000000e+00> : vector<2xf32>
    %216 = vector.multi_reduction <add>, %215, %cst_77 [1] : vector<2x5xf32> to vector<2xf32>
    %217 = vector.shape_cast %216 : vector<2xf32> to vector<2x1xf32>
    %218 = tpu.reciprocal %217 {approx = true} : vector<2x1xf32> -> vector<2x1xf32>
    %219 = vector.broadcast %218 : vector<2x1xf32> to vector<2x5xf32>
    %220 = arith.mulf %215, %219 : vector<2x5xf32>
    %cst_78 = arith.constant 0x7F800000 : f32
    %221 = vector.broadcast %cst_78 : f32 to vector<2x5xf32>
    %222 = arith.select %136, %220, %221 : vector<2x5xi1>, vector<2x5xf32>
    %223 = vector.shape_cast %222 : vector<2x5xf32> to vector<1x2x5xf32>
    %cst_79 = arith.constant dense<0x7F800000> : vector<1xf32>
    %224 = vector.multi_reduction <minimumf>, %223, %cst_79 [1, 2] : vector<1x2x5xf32> to vector<1xf32>
    %225 = vector.shape_cast %224 : vector<1xf32> to vector<1x1x1xf32>
    %226 = vector.extract %225[0, 0, 0] : f32 from vector<1x1x1xf32>
    %cst_80 = arith.constant 0xFF800000 : f32
    %227 = vector.broadcast %cst_80 : f32 to vector<2x5xf32>
    %228 = arith.select %136, %220, %227 : vector<2x5xi1>, vector<2x5xf32>
    %229 = vector.shape_cast %228 : vector<2x5xf32> to vector<1x2x5xf32>
    %cst_81 = arith.constant dense<0xFF800000> : vector<1xf32>
    %230 = vector.multi_reduction <maximumf>, %229, %cst_81 [1, 2] : vector<1x2x5xf32> to vector<1xf32>
    %231 = vector.shape_cast %230 : vector<1xf32> to vector<1x1x1xf32>
    %232 = vector.extract %231[0, 0, 0] : f32 from vector<1x1x1xf32>
    %233 = arith.subf %232, %226 : f32
    %cst_82 = arith.constant 2.550000e+02 : f32
    %234 = arith.divf %233, %cst_82 : f32
    %cst_83 = arith.constant 0.000000e+00 : f32
    %235 = arith.cmpf oeq, %234, %cst_83 : f32
    %cst_84 = arith.constant 1.000000e+00 : f32
    %236 = arith.select %235, %cst_84, %234 : f32
    %cst_85 = arith.constant 1.000000e+00 : f32
    %237 = arith.divf %cst_85, %236 : f32
    %238 = arith.mulf %226, %237 : f32
    %239 = math.roundeven %238 : f32
    %cst_86 = arith.constant 0.000000e+00 : f32
    %240 = arith.subf %cst_86, %239 : f32
    %241 = vector.broadcast %237 : f32 to vector<2x5xf32>
    %242 = arith.mulf %220, %241 : vector<2x5xf32>
    %243 = vector.broadcast %240 : f32 to vector<2x5xf32>
    %244 = arith.addf %242, %243 : vector<2x5xf32>
    %245 = math.roundeven %244 : vector<2x5xf32>
    %cst_87 = arith.constant 0.000000e+00 : f32
    %cst_88 = arith.constant 2.550000e+02 : f32
    %246 = vector.broadcast %cst_87 : f32 to vector<2x5xf32>
    %247 = arith.maximumf %246, %245 : vector<2x5xf32>
    %248 = vector.broadcast %cst_88 : f32 to vector<2x5xf32>
    %249 = arith.minimumf %248, %247 : vector<2x5xf32>
    %250 = vector.broadcast %240 : f32 to vector<2x5xf32>
    %251 = arith.subf %249, %250 : vector<2x5xf32>
    %252 = vector.broadcast %236 : f32 to vector<2x5xf32>
    %253 = arith.mulf %251, %252 : vector<2x5xf32>
    %254 = arith.cmpf oeq, %226, %232 : f32
    %255 = arith.select %254, %220, %253 : vector<2x5xf32>
    %256 = arith.select %136, %255, %206 : vector<2x5xi1>, vector<2x5xf32>
    %c0_89 = arith.constant 0 : index
    %c0_90 = arith.constant 0 : index
    %257 = vector.load %arg6[%c0_89, %c0_90] : memref<2x5xf32, #tpu.memory_space<vmem>>, vector<2x5xf32>
    tpu.vector_store %arg6[%c0_89, %c0_90], %256 {strides = array<i32>} : memref<2x5xf32, #tpu.memory_space<vmem>>, vector<2x5xf32>,
    return
  }
  func.func @transform_0(%arg0: i32) -> (i32, i32) {
    %c0_i32 = arith.constant 0 : i32
    %c0_i32_0 = arith.constant 0 : i32
    %c0_i32_1 = arith.constant 0 : i32
    return %c0_i32, %c0_i32_0 : i32, i32
  }
  func.func @transform_1(%arg0: i32) -> (i32, i32) {
    %c0_i32 = arith.constant 0 : i32
    %c0_i32_0 = arith.constant 0 : i32
    %c0_i32_1 = arith.constant 0 : i32
    return %c0_i32, %c0_i32_0 : i32, i32
  }
  func.func @transform_2(%arg0: i32) -> (i32, i32) {
    %c0_i32 = arith.constant 0 : i32
    %c0_i32_0 = arith.constant 0 : i32
    %c0_i32_1 = arith.constant 0 : i32
    return %c0_i32, %c0_i32_0 : i32, i32
  }
  func.func @transform_3(%arg0: i32) -> (i32, i32) {
    %c0_i32 = arith.constant 0 : i32
    %c0_i32_0 = arith.constant 0 : i32
    %c0_i32_1 = arith.constant 0 : i32
    return %c0_i32, %c0_i32_0 : i32, i32
  }
  func.func @transform_4(%arg0: i32) -> (i32, i32) {
    %c0_i32 = arith.constant 0 : i32
    %c0_i32_0 = arith.constant 0 : i32
    %c0_i32_1 = arith.constant 0 : i32
    return %c0_i32, %c0_i32_0 : i32, i32
  }
  func.func @transform_5(%arg0: i32) -> (i32, i32) {
    %c0_i32 = arith.constant 0 : i32
    %c0_i32_0 = arith.constant 0 : i32
    %c0_i32_1 = arith.constant 0 : i32
    return %c0_i32, %c0_i32_0 : i32, i32
  }
}

</mosaic_0001>

<bundles_post_ra>
// kernel: tpu_custom_call.1
= control target key start
LH: loop header
LB: loop body
LE: loop exit
PB: predicated region body
PF: predicated region fallthrough
CT: control target
= control target key end

     0   :  { %vm22_vm0 = vcmask 58368   ;;  %s907_s0 = inlined_call_operand.vmem [shape: f32[2,8], index: 0, kind: input, shape index: {}]   ;;  %s908_s1 = inlined_call_operand.vmem [shape: f32[8,32], index: 1, kind: input, shape index: {}]   ;;  %s909_s2 = inlined_call_operand.vmem [shape: f32[1,32], index: 2, kind: input, shape index: {}]   ;;  %s910_s3 = inlined_call_operand.vmem [shape: f32[32,5], index: 3, kind: input, shape index: {}]   ;;  %s911_s4 = inlined_call_operand.vmem [shape: f32[1,5], index: 4, kind: input, shape index: {}]   ;;  %s912_s5 = inlined_call_operand.hbm [shape: f32[2,5], index: 5, kind: output, shape index: {}]  }
   0x1   :  { %v722_v0 = vld [vmem:[%s907_s0] sm:$0x3] }
   0x2   :  { %10 = vsyncpa [#allocation3], 0  ;;  %v23_v1 = vsel %vm22_vm0, %v722_v0, inf  ;;  %v33_v2 = vsel %vm22_vm0, %v722_v0, -inf  ;;  %v77_v17 = vld [vmem:[%s908_s1] sm:$0xff]  ;;  %v683_v18 = vmov 0.0  }
   0x3   :  { %24 = vmin.xlane.f32.xlu0 %v23_v1  ;;  %577 = vmatprep.subr.mxu0 %v683_v18  ;;  %vm684_vm1 = vmmov 0   ;;  %vm85_vm2 = vcmask 64512   ;;  %v566_v32 = vld [vmem:[%s909_s2] ss:$0 sm:$0xff]  ;;  %vm159_vm4 = vcmask 254976   ;;  %v281_v55 = vld [vmem:[%s910_s3 + $0x8] sm:$0xff] }
   0x4   :  { %579 = vmatprep.mubr.msk.f32.mxu0 %vm684_vm1, %v683_v18  ;;  %578 = vmatpush3.msra.mxu0 %v77_v17  ;;  %v280_v54 = vld [vmem:[%s910_s3] sm:$0xff]  ;;  %v685_v57 = vmov 0.0|0.0   ;;  %v282_v58 = vld [vmem:[%s910_s3 + $0x10] sm:$0xff]  ;;  %v283_v59 = vld [vmem:[%s910_s3 + $0x18] sm:$0xff]  ;;  %s686_s0 = smov 0.0   ;;  %vm291_vm6 = vcmask 261120  }
   0x5   :  { %590 = vmatprep.mubr.msk.f32.mxu1 %vm684_vm1, %v683_v18  ;;  %v594_v56 = vpack.c.bf16 %v281_v55, %v280_v54  ;;  %593 = vmatprep.subr.bf16.mxu1 %v685_v57  ;;  %v597_v60 = vpack.c.bf16 %v283_v59, %v282_v58  ;;  %vm369_vm9 = vcmask 33792  }
   0x7   :  { %34 = vmax.xlane.f32.xlu0 %v33_v2  ;;  %595 = vmatpush3.bf16.msra.mxu1 %v594_v56 }
   0x8   :  { %596 = vmatprep.subr.bf16.mxu1 %v685_v57 }
   0xb   :  { %598 = vmatpush3.bf16.msra.mxu1 %v597_v60 }
  0x90   :  { %v25_v3 = vpop.xlane.xlu0 %24 }
  0x91   :  { %v26_v4 = vrot.slane %v25_v3, 4 }
  0x93   :  { %v27_v5 = vmin.f32 %v25_v3, %v26_v4 }
  0x94   :  { %v35_v6 = vpop.xlane.xlu0 %34 }
  0x95   :  { %v28_v7 = vrot.slane %v27_v5, 2  ;;  %v36_v8 = vrot.slane %v35_v6, 4 }
  0x97   :  { %v37_v9 = vmax.f32 %v35_v6, %v36_v8  ;;  %v29_v10 = vmin.f32 %v27_v5, %v28_v7 }
  0x99   :  { %v38_v11 = vrot.slane %v37_v9, 2  ;;  %v30_v12 = vrot.slane %v29_v10, 1 }
  0x9b   :  { %v31_v13 = vmin.f32 %v29_v10, %v30_v12  ;;  %v39_v14 = vmax.f32 %v37_v9, %v38_v11 }
  0x9d   :  { %599 = vpush %v31_v13  ;;  %v40_v15 = vrot.slane %v39_v14, 1 }
  0x9f   :  { %v41_v16 = vmax.f32 %v39_v14, %v40_v15 }
  0xa1   :  { %601 = vpush %v41_v16 }
  0xce   :  { %s600_s21 = spop %599 }
  0xd2   :  { %s602_s22 = spop %601 }
  0xd3   :  { %s43_s23 = ssub.f32 %s602_s22, %s600_s21  ;;  %p72_p2 = scmp.eq.f32.partialorder %s600_s21, %s602_s22 }
  0xd5   :  { %s46_s24 = smul.f32 0.003921569, %s43_s23 }
  0xd6   :  { %s73_s8 = scalar_select %p72_p2, 1, 0 }
  0xd7   :  { %p47_p0 = scmp.eq.f32.partialorder %s46_s24, 0.0 }
  0xd8   :  { %v74_v28 = vstv %s73_s8 }
  0xd9   :  { %s914_s24 = smov (%p47_p0, %s46_s24), 1.0  ;;  %vm75_vm3 = vcmp.eq.s32.totalorder %v74_v28, 1 }
  0xda   :  { %v49_v19 = vstv %s914_s24 }
  0xdb   :  { %643 = vrcp.f32 %v49_v19 }
  0xe5   :  { %v644_v20 = vpop.eup %643 }
  0xe6   :  { %603 = vpush %v644_v20 }
 0x117   :  { %s604_s25 = spop %603 }
 0x118   :  { %s52_s26 = smul.f32 %s604_s25, %s600_s21  ;;  %v62_v21 = vstv %s604_s25 }
 0x119   :  { %v63_v22 = vmul.f32 %v62_v21, %v722_v0 }
 0x11a   :  { %s53_s27 = scvt.f32.s32 %s52_s26  ;;  %s58_s1 = sand.u32 2147483647, %s52_s26 }
 0x11b   :  { %s56_s29 = sand.u32 2147483648, %s52_s26  ;;  %p59_p1 = scmp.lt.f32.partialorder %s58_s1, 2.1474836e+09 }
 0x11c   :  { %s54_s28 = scvt.s32.f32 %s53_s27 }
 0x11e   :  { %s55_s30 = sand.u32 2147483647, %s54_s28 }
 0x11f   :  { %s57_s6 = sor.u32 %s56_s29, %s55_s30 }
 0x120   :  { %s916_s6 = smov (!%p59_p1, %s57_s6), %s52_s26 }
 0x121   :  { %s61_s7 = ssub.f32 0.0, %s916_s6 }
 0x123   :  { %v64_v23 = vstv %s61_s7 }
 0x124   :  { %v65_v24 = vadd.f32 %v64_v23, %v63_v22  ;;  %v365_v22 = vlaneseq }
 0x126   :  { %v605_v25 = vround.rtne.f32 %v65_v24  ;;  %v568_v24 = vld [vmem:[%s911_s4] ss:$0 sm:$0xff] }
 0x128   :  { %v67_v26 = vmax.f32 %v605_v25, 0.0 }
 0x12a   :  { %v68_v27 = vmin.f32 %v67_v26, 255.0 }
 0x12c   :  { %v69_v29 = vsub.f32 %v68_v27, %v64_v23  ;;  %v806_v23 = vand.u32 127, %v365_v22 }
 0x12e   :  { %v71_v30 = vmul.f32 %v69_v29, %v49_v19  ;;  %vm367_vm8 = vcmp.lt.s32.totalorder %v806_v23, 4 }
 0x130   :  { %v76_v31 = vsel %vm75_vm3, %v722_v0, %v71_v30 }
 0x131   :  { %580 = vmatmul.mubr.msk.f32.vlgmr.msra.gmra.mrb[0].mxu0 %vm85_vm2, %v76_v31 }
 0x204   :  { %v155_v33 = vpop.f32.mrb[0].mxu0 }
 0x205   :  { %v734_v34 = vadd.f32 %v566_v32, %v155_v33  ;;  %v581_v35 = vpop.f32.mrb[1].mxu0 }
 0x207   :  { %v160_v36 = vsel %vm159_vm4, %v734_v34, inf  ;;  %v170_v37 = vsel %vm159_vm4, %v734_v34, -inf }
 0x208   :  { %161 = vmin.xlane.f32.xlu1 %v160_v36 }
 0x20c   :  { %171 = vmax.xlane.f32.xlu1 %v170_v37 }
 0x295   :  { %v162_v38 = vpop.xlane.xlu1 %161 }
 0x296   :  { %v163_v39 = vrot.slane %v162_v38, 4 }
 0x298   :  { %v164_v40 = vmin.f32 %v162_v38, %v163_v39 }
 0x299   :  { %v172_v41 = vpop.xlane.xlu1 %171 }
 0x29a   :  { %v165_v42 = vrot.slane %v164_v40, 2  ;;  %v173_v43 = vrot.slane %v172_v41, 4 }
 0x29c   :  { %v174_v44 = vmax.f32 %v172_v41, %v173_v43  ;;  %v166_v45 = vmin.f32 %v164_v40, %v165_v42 }
 0x29e   :  { %v175_v46 = vrot.slane %v174_v44, 2  ;;  %v167_v47 = vrot.slane %v166_v45, 1 }
 0x2a0   :  { %v168_v48 = vmin.f32 %v166_v45, %v167_v47  ;;  %v176_v49 = vmax.f32 %v174_v44, %v175_v46 }
 0x2a2   :  { %606 = vpush %v168_v48  ;;  %v177_v50 = vrot.slane %v176_v49, 1 }
 0x2a4   :  { %v178_v51 = vmax.f32 %v176_v49, %v177_v50 }
 0x2a6   :  { %608 = vpush %v178_v51 }
 0x2d3   :  { %s738_s2 = spop %606 }
 0x2d7   :  { %s740_s11 = spop %608 }
 0x2d8   :  { %s180_s12 = ssub.f32 %s740_s11, %s738_s2  ;;  %p209_p7 = scmp.eq.f32.partialorder %s738_s2, %s740_s11 }
 0x2da   :  { %s183_s13 = smul.f32 0.003921569, %s180_s12 }
 0x2dc   :  { %p184_p3 = scmp.eq.f32.partialorder %s183_s13, 0.0 }
 0x2de   :  { %s918_s13 = smov (%p184_p3, %s183_s13), 1.0 }
 0x2df   :  { %v186_v52 = vstv %s918_s13 }
 0x2e0   :  { %645 = vrcp.f32 %v186_v52 }
 0x2ea   :  { %v646_v53 = vpop.eup %645 }
 0x2eb   :  { %610 = vpush %v646_v53 }
 0x31c   :  { %s755_s18 = spop %610 }
 0x31d   :  { %s189_s22 = smul.f32 %s755_s18, %s738_s2  ;;  %v199_v63 = vstv %s755_s18 }
 0x31e   :  { %s228_s29 = smul.f32 %s755_s18, %s740_s11  ;;  %v200_v1 = vmul.f32 %v199_v63, %v734_v34 }
 0x31f   :  { %s190_s23 = scvt.f32.s32 %s189_s22  ;;  %s195_s24 = sand.u32 2147483647, %s189_s22 }
 0x320   :  { %s193_s26 = sand.u32 2147483648, %s189_s22  ;;  %p196_p4 = scmp.lt.f32.partialorder %s195_s24, 2.1474836e+09 }
 0x321   :  { %s191_s25 = scvt.s32.f32 %s190_s23 }
 0x323   :  { %s192_s27 = sand.u32 2147483647, %s191_s25 }
 0x324   :  { %s194_s1 = sor.u32 %s193_s26, %s192_s27 }
 0x325   :  { %s920_s1 = smov (!%p196_p4, %s194_s1), %s189_s22 }
 0x326   :  { %s765_s28 = ssub.f32 0.0, %s920_s1 }
 0x328   :  { %s214_s30 = sadd.f32 %s765_s28, %s189_s22  ;;  %s687_s22 = smov 255.0   ;;  %v201_v0 = vstv %s765_s28 }
 0x329   :  { %s229_s6 = sadd.f32 %s228_s29, %s765_s28  ;;  %v202_v2 = vadd.f32 %v201_v0, %v200_v1 }
 0x32a   :  { %s215_s7 = scvt.f32.s32 %s214_s30  ;;  %s220_s3 = sand.u32 2147483647, %s214_s30 }
 0x32b   :  { %s230_s8 = scvt.f32.s32 %s229_s6  ;;  %s218_s10 = sand.u32 2147483648, %s214_s30  ;;  %v612_v3 = vround.rtne.f32 %v202_v2 }
 0x32c   :  { %s216_s9 = scvt.s32.f32 %s215_s7  ;;  %p221_p5 = scmp.lt.f32.partialorder %s220_s3, 2.1474836e+09 }
 0x32d   :  { %s231_s12 = scvt.s32.f32 %s230_s8  ;;  %s235_s15 = sand.u32 2147483647, %s229_s6  ;;  %v204_v4 = vmax.f32 %v612_v3, 0.0 }
 0x32e   :  { %s217_s14 = sand.u32 2147483647, %s216_s9  ;;  %s233_s19 = sand.u32 2147483648, %s229_s6 }
 0x32f   :  { %s219_s16 = sor.u32 %s218_s10, %s217_s14  ;;  %s232_s17 = sand.u32 2147483647, %s231_s12  ;;  %v205_v5 = vmin.f32 %v204_v4, 255.0 }
 0x330   :  { %s922_s16 = smov (!%p221_p5, %s219_s16), %s214_s30  ;;  %s234_s21 = sor.u32 %s233_s19, %s232_s17 }
 0x331   :  { %s223_s20 = smax.f32 %s686_s0, %s922_s16  ;;  %p236_p6 = scmp.lt.f32.partialorder %s235_s15, 2.1474836e+09  ;;  %v206_v6 = vsub.f32 %v205_v5, %v201_v0 }
 0x332   :  { %s224_s23 = smin.f32 %s687_s22, %s223_s20 }
 0x333   :  { %s225_s24 = ssub.f32 %s224_s23, %s765_s28  ;;  %s924_s21 = smov (!%p236_p6, %s234_s21), %s229_s6  ;;  %v208_v7 = vmul.f32 %v206_v6, %v186_v52 }
 0x334   :  { %s238_s26 = smax.f32 %s686_s0, %s924_s21 }
 0x335   :  { %s226_s25 = smul.f32 %s225_s24, %s918_s13  ;;  %s239_s27 = smin.f32 %s687_s22, %s238_s26 }
 0x336   :  { %s240_s1 = ssub.f32 %s239_s27, %s765_s28 }
 0x337   :  { %s227_s29 = scalar_select %p209_p7, %s738_s2, %s226_s25 }
 0x338   :  { %s241_s30 = smul.f32 %s240_s1, %s918_s13 }
 0x339   :  { %s781_s7 = smax.f32 %s686_s0, %s227_s29 }
 0x33a   :  { %s242_s3 = scalar_select %p209_p7, %s740_s11, %s241_s30 }
 0x33b   :  { %s210_s10 = scalar_select %p209_p7, 1, 0 }
 0x33c   :  { %s787_s8 = smax.f32 %s686_s0, %s242_s3 }
 0x33d   :  { %s246_s9 = ssub.f32 %s787_s8, %s781_s7  ;;  %v211_v8 = vstv %s210_s10  ;;  %p275_p10 = scmp.eq.f32.partialorder %s781_s7, %s787_s8 }
 0x33e   :  { %vm212_vm5 = vcmp.eq.s32.totalorder %v211_v8, 1 }
 0x33f   :  { %s249_s6 = smul.f32 0.003921569, %s246_s9  ;;  %v213_v9 = vsel %vm212_vm5, %v734_v34, %v208_v7 }
 0x340   :  { %v243_v11 = vmax.f32 %v213_v9, 0.0  ;;  %s276_s11 = scalar_select %p275_p10, 1, 0 }
 0x341   :  { %p250_p8 = scmp.eq.f32.partialorder %s249_s6, 0.0 }
 0x342   :  { %v277_v19 = vstv %s276_s11 }
 0x343   :  { %s926_s6 = smov (%p250_p8, %s249_s6), 1.0  ;;  %vm278_vm7 = vcmp.eq.s32.totalorder %v277_v19, 1 }
 0x344   :  { %v252_v61 = vstv %s926_s6 }
 0x345   :  { %647 = vrcp.f32 %v252_v61 }
 0x34f   :  { %v648_v62 = vpop.eup %647 }
 0x350   :  { %613 = vpush %v648_v62 }
 0x381   :  { %s614_s12 = spop %613 }
 0x382   :  { %s255_s14 = smul.f32 %s614_s12, %s781_s7  ;;  %v265_v10 = vstv %s614_s12 }
 0x383   :  { %v266_v12 = vmul.f32 %v265_v10, %v243_v11 }
 0x384   :  { %s256_s15 = scvt.f32.s32 %s255_s14  ;;  %s261_s16 = sand.u32 2147483647, %s255_s14 }
 0x385   :  { %s259_s28 = sand.u32 2147483648, %s255_s14  ;;  %p262_p9 = scmp.lt.f32.partialorder %s261_s16, 2.1474836e+09 }
 0x386   :  { %s257_s18 = scvt.s32.f32 %s256_s15 }
 0x388   :  { %s258_s17 = sand.u32 2147483647, %s257_s18 }
 0x389   :  { %s260_s19 = sor.u32 %s259_s28, %s258_s17 }
 0x38a   :  { %s928_s19 = smov (!%p262_p9, %s260_s19), %s255_s14 }
 0x38b   :  { %s264_s2 = ssub.f32 0.0, %s928_s19 }
 0x38d   :  { %v267_v13 = vstv %s264_s2 }
 0x38e   :  { %v268_v14 = vadd.f32 %v267_v13, %v266_v12 }
 0x390   :  { %v615_v15 = vround.rtne.f32 %v268_v14 }
 0x392   :  { %v270_v16 = vmax.f32 %v615_v15, 0.0 }
 0x394   :  { %v271_v17 = vmin.f32 %v270_v16, 255.0 }
 0x396   :  { %v272_v18 = vsub.f32 %v271_v17, %v267_v13 }
 0x398   :  { %v274_v20 = vmul.f32 %v272_v18, %v252_v61 }
 0x39a   :  { %v279_v21 = vsel %vm278_vm7, %v243_v11, %v274_v20 }
 0x39b   :  { %591 = vmatmul.mubr.msk.f32.vlgmr.msra.gmra.mrb[0].mxu1 %vm291_vm6, %v279_v21 }
 0x46e   :  { %v361_v25 = vpop.f32.mrb[0].mxu1 }
 0x46f   :  { %v812_v26 = vadd.f32 %v568_v24, %v361_v25  ;;  %v592_v27 = vpop.f32.mrb[1].mxu1 }
 0x471   :  { %v380_v28 = vsel %vm367_vm8, %v812_v26, -inf  ;;  %v368_v29 = vsel %vm367_vm8, %v812_v26, inf  ;;  %v402_v32 = vsel %vm367_vm8, -inf, %v812_v26  ;;  %v391_v33 = vsel %vm367_vm8, inf, %v812_v26 }
 0x472   :  { %v381_v30 = vsel %vm369_vm9, %v380_v28, -inf  ;;  %v370_v31 = vsel %vm369_vm9, %v368_v29, inf  ;;  %v403_v34 = vsel %vm369_vm9, %v402_v32, -inf  ;;  %v392_v35 = vsel %vm369_vm9, %v391_v33, inf }
 0x473   :  { %382 = vmax.xlane.f32.xlu1 %v381_v30  ;;  %371 = vmin.xlane.f32.xlu0 %v370_v31 }
 0x477   :  { %404 = vmax.xlane.f32.xlu1 %v403_v34  ;;  %393 = vmin.xlane.f32.xlu0 %v392_v35 }
 0x500   :  { %v383_v36 = vpop.xlane.xlu1 %382  ;;  %v372_v37 = vpop.xlane.xlu0 %371 }
 0x501   :  { %v384_v38 = vrot.slane %v383_v36, 4  ;;  %v373_v39 = vrot.slane %v372_v37, 4 }
 0x503   :  { %v385_v40 = vmax.f32 %v383_v36, %v384_v38  ;;  %v374_v41 = vmin.f32 %v372_v37, %v373_v39 }
 0x504   :  { %v405_v42 = vpop.xlane.xlu1 %404  ;;  %v394_v43 = vpop.xlane.xlu0 %393 }
 0x505   :  { %v386_v44 = vrot.slane %v385_v40, 2  ;;  %v375_v45 = vrot.slane %v374_v41, 2  ;;  %v406_v46 = vrot.slane %v405_v42, 4  ;;  %v395_v47 = vrot.slane %v394_v43, 4 }
 0x507   :  { %v407_v48 = vmax.f32 %v405_v42, %v406_v46  ;;  %v396_v49 = vmin.f32 %v394_v43, %v395_v47  ;;  %v376_v50 = vmin.f32 %v374_v41, %v375_v45  ;;  %v387_v51 = vmax.f32 %v385_v40, %v386_v44 }
 0x509   :  { %v408_v52 = vrot.slane %v407_v48, 2  ;;  %v397_v53 = vrot.slane %v396_v49, 2  ;;  %v377_v54 = vrot.slane %v376_v50, 1  ;;  %v388_v55 = vrot.slane %v387_v51, 1 }
 0x50b   :  { %v378_v56 = vmin.f32 %v376_v50, %v377_v54  ;;  %v389_v57 = vmax.f32 %v387_v51, %v388_v55  ;;  %v398_v58 = vmin.f32 %v396_v49, %v397_v53  ;;  %v409_v59 = vmax.f32 %v407_v48, %v408_v52 }
 0x50d   :  { %616 = vpush %v378_v56  ;;  %v399_v60 = vrot.slane %v398_v58, 1  ;;  %v410_v61 = vrot.slane %v409_v59, 1 }
 0x50e   :  { %618 = vpush %v389_v57 }
 0x50f   :  { %v400_v62 = vmin.f32 %v398_v58, %v399_v60  ;;  %v411_v63 = vmax.f32 %v409_v59, %v410_v61 }
 0x511   :  { %620 = vpush %v400_v62 }
 0x512   :  { %622 = vpush %v411_v63 }
 0x53e   :  { %s830_s4 = spop %616 }
 0x53f   :  { %s832_s20 = spop %618 }
 0x540   :  { %s413_s21 = ssub.f32 %s832_s20, %s830_s4  ;;  %p442_p0 = scmp.eq.f32.partialorder %s830_s4, %s832_s20 }
 0x542   :  { %s416_s22 = smul.f32 0.003921569, %s413_s21  ;;  %s836_s23 = spop %620 }
 0x543   :  { %s838_s24 = spop %622 }
 0x544   :  { %p417_p11 = scmp.eq.f32.partialorder %s416_s22, 0.0  ;;  %s447_s25 = ssub.f32 %s838_s24, %s836_s23 }
 0x545   :  { %s443_s10 = scalar_select %p442_p0, 1, 0 }
 0x546   :  { %s930_s22 = smov (%p417_p11, %s416_s22), 1.0  ;;  %s450_s26 = smul.f32 0.003921569, %s447_s25 }
 0x547   :  { %v419_v0 = vstv %s930_s22  ;;  %v444_v11 = vstv %s443_s10  ;;  %p476_p4 = scmp.eq.f32.partialorder %s836_s23, %s838_s24 }
 0x548   :  { %649 = vrcp.f32 %v419_v0  ;;  %p451_p12 = scmp.eq.f32.partialorder %s450_s26, 0.0  ;;  %vm445_vm10 = vcmp.eq.s32.totalorder %v444_v11, 1 }
 0x54a   :  { %s932_s26 = smov (%p451_p12, %s450_s26), 1.0 }
 0x54b   :  { %v453_v1 = vstv %s932_s26 }
 0x54c   :  { %651 = vrcp.f32 %v453_v1 }
 0x552   :  { %v650_v2 = vpop.eup %649 }
 0x553   :  { %624 = vpush %v650_v2 }
 0x556   :  { %v652_v3 = vpop.eup %651 }
 0x557   :  { %627 = vpush %v652_v3 }
 0x584   :  { %s625_s27 = spop %624 }
 0x585   :  { %s422_s1 = smul.f32 %s625_s27, %s830_s4  ;;  %v432_v4 = vstv %s625_s27 }
 0x586   :  { %v433_v5 = vmul.f32 %v432_v4, %v812_v26 }
 0x587   :  { %s423_s29 = scvt.f32.s32 %s422_s1  ;;  %s428_s30 = sand.u32 2147483647, %s422_s1 }
 0x588   :  { %s426_s3 = sand.u32 2147483648, %s422_s1  ;;  %p429_p13 = scmp.lt.f32.partialorder %s428_s30, 2.1474836e+09 }
 0x589   :  { %s424_s7 = scvt.s32.f32 %s423_s29  ;;  %s628_s12 = spop %627 }
 0x58a   :  { %s456_s28 = smul.f32 %s628_s12, %s836_s23  ;;  %v466_v48 = vstv %s628_s12 }
 0x58b   :  { %s425_s8 = sand.u32 2147483647, %s424_s7  ;;  %v467_v50 = vmul.f32 %v466_v48, %v812_v26 }
 0x58c   :  { %s427_s9 = sor.u32 %s426_s3, %s425_s8  ;;  %s457_s17 = scvt.f32.s32 %s456_s28 }
 0x58d   :  { %s934_s9 = smov (!%p429_p13, %s427_s9), %s422_s1  ;;  %s462_s11 = sand.u32 2147483647, %s456_s28 }
 0x58e   :  { %s431_s6 = ssub.f32 0.0, %s934_s9  ;;  %s458_s19 = scvt.s32.f32 %s457_s17 }
 0x58f   :  { %s460_s13 = sand.u32 2147483648, %s456_s28  ;;  %p463_p2 = scmp.lt.f32.partialorder %s462_s11, 2.1474836e+09 }
 0x590   :  { %v434_v6 = vstv %s431_s6  ;;  %s459_s2 = sand.u32 2147483647, %s458_s19  ;;  %s688_s9 = smov [#allocation2]  }
 0x591   :  { %v435_v7 = vadd.f32 %v434_v6, %v433_v5  ;;  %s461_s0 = sor.u32 %s460_s13, %s459_s2  ;;  %s558_s6 = sshll.u32 %s688_s9, 4  ;;  %s559_s6 = int_to_ptr.vmem [resolvable:$true] %s558_s6 }
 0x592   :  { %s938_s0 = smov (!%p463_p2, %s461_s0), %s456_s28  ;;  %s659_s23 = scalar_lea.vmem %s559_s6, 32 }
 0x593   :  { %v626_v8 = vround.rtne.f32 %v435_v7  ;;  %s465_s4 = ssub.f32 0.0, %s938_s0  ;;  %p660_p6 = scmp.ne.s32.totalorder %s559_s6, %s659_s23 }
 0x594   :  { %s477_s3 = scalar_select %p476_p4, 1, 0 }
 0x595   :  { %v437_v9 = vmax.f32 %v626_v8, 0.0  ;;  %v468_v49 = vstv %s465_s4  ;;  %p664_p7 = scmp.lt.s32.totalorder %s559_s6, %s559_s6  ;;  %p665_p8 = scmp.lt.s32.totalorder %s659_s23, %s659_s23 }
 0x596   :  { %v469_v51 = vadd.f32 %v468_v49, %v467_v50  ;;  %v478_v63 = vstv %s477_s3 }
 0x597   :  { %v438_v10 = vmin.f32 %v437_v9, 255.0  ;;  %vm479_vm11 = vcmp.eq.s32.totalorder %v478_v63, 1  ;;  %p666_p9 = por %p665_p8, %p664_p7 }
 0x598   :  { %v629_v52 = vround.rtne.f32 %v469_v51 }
 0x599   :  { %v439_v12 = vsub.f32 %v438_v10, %v434_v6  ;;  %p667_p10 = pnand %p666_p9, %p660_p6 }
 0x59a   :  { %v471_v54 = vmax.f32 %v629_v52, 0.0 }
 0x59b   :  { %v441_v13 = vmul.f32 %v439_v12, %v419_v0 }
 0x59c   :  { %v472_v57 = vmin.f32 %v471_v54, 255.0 }
 0x59d   :  { %v446_v14 = vsel %vm445_vm10, %v812_v26, %v441_v13 }
 0x59e   :  { %v481_v15 = vsel %vm367_vm8, %v446_v14, -inf  ;;  %v473_v60 = vsub.f32 %v472_v57, %v468_v49 }
 0x59f   :  { %v482_v16 = vsel %vm369_vm9, %v481_v15, -inf }
 0x5a0   :  { %483 = vmax.xlane.f32.xlu0 %v482_v16  ;;  %v475_v0 = vmul.f32 %v473_v60, %v453_v1 }
 0x5a2   :  { %v480_v5 = vsel %vm479_vm11, %v812_v26, %v475_v0 }
 0x62d   :  { %v484_v17 = vpop.xlane.xlu0 %483 }
 0x62e   :  { %v485_v18 = vsub.f32 %v446_v14, %v484_v17 }
 0x630   :  { %v486_v19 = vmul.f32 1.442695, %v485_v18 }
 0x632   :  { %653 = vpow2.f32 %v486_v19 }
 0x63c   :  { %v654_v20 = vpop.eup %653 }
 0x63d   :  { %v488_v21 = vsel %vm367_vm8, %v654_v20, 0.0 }
 0x63e   :  { %v489_v22 = vsel %vm369_vm9, %v488_v21, 0.0 }
 0x63f   :  { %490 = vadd.xlane.f32.xlu1 %v489_v22 }
 0x6cc   :  { %v491_v24 = vpop.xlane.xlu1 %490 }
 0x6cd   :  { %655 = vrcp.f32 %v491_v24 }
 0x6d7   :  { %v656_v25 = vpop.eup %655 }
 0x6d8   :  { %v861_v27 = vmul.f32 %v656_v25, %v488_v21 }
 0x6da   :  { %v505_v28 = vsel %vm367_vm8, %v861_v27, -inf  ;;  %v494_v29 = vsel %vm367_vm8, %v861_v27, inf }
 0x6db   :  { %v506_v30 = vsel %vm369_vm9, %v505_v28, -inf  ;;  %v495_v31 = vsel %vm369_vm9, %v494_v29, inf }
 0x6dc   :  { %507 = vmax.xlane.f32.xlu1 %v506_v30  ;;  %496 = vmin.xlane.f32.xlu0 %v495_v31 }
 0x769   :  { %v508_v32 = vpop.xlane.xlu1 %507  ;;  %v497_v33 = vpop.xlane.xlu0 %496 }
 0x76a   :  { %v509_v34 = vrot.slane %v508_v32, 4  ;;  %v498_v35 = vrot.slane %v497_v33, 4 }
 0x76c   :  { %v510_v36 = vmax.f32 %v508_v32, %v509_v34  ;;  %v499_v37 = vmin.f32 %v497_v33, %v498_v35 }
 0x76e   :  { %v511_v38 = vrot.slane %v510_v36, 2  ;;  %v500_v39 = vrot.slane %v499_v37, 2 }
 0x770   :  { %v512_v40 = vmax.f32 %v510_v36, %v511_v38  ;;  %v501_v41 = vmin.f32 %v499_v37, %v500_v39 }
 0x772   :  { %v502_v42 = vrot.slane %v501_v41, 1  ;;  %v513_v43 = vrot.slane %v512_v40, 1 }
 0x774   :  { %v503_v44 = vmin.f32 %v501_v41, %v502_v42  ;;  %v514_v45 = vmax.f32 %v512_v40, %v513_v43 }
 0x776   :  { %630 = vpush %v503_v44 }
 0x777   :  { %632 = vpush %v514_v45 }
 0x7a7   :  { %s871_s14 = spop %630 }
 0x7a8   :  { %s873_s15 = spop %632 }
 0x7a9   :  { %s516_s16 = ssub.f32 %s873_s15, %s871_s14  ;;  %p545_p5 = scmp.eq.f32.partialorder %s871_s14, %s873_s15 }
 0x7ab   :  { %s519_s18 = smul.f32 0.003921569, %s516_s16 }
 0x7ac   :  { %s546_s8 = scalar_select %p545_p5, 1, 0 }
 0x7ad   :  { %p520_p1 = scmp.eq.f32.partialorder %s519_s18, 0.0 }
 0x7ae   :  { %v547_v2 = vstv %s546_s8 }
 0x7af   :  { %s936_s18 = smov (%p520_p1, %s519_s18), 1.0  ;;  %vm548_vm12 = vcmp.eq.s32.totalorder %v547_v2, 1 }
 0x7b0   :  { %v522_v46 = vstv %s936_s18 }
 0x7b1   :  { %657 = vrcp.f32 %v522_v46 }
 0x7bb   :  { %v658_v47 = vpop.eup %657 }
 0x7bc   :  { %634 = vpush %v658_v47 }
 0x7ed   :  { %s635_s20 = spop %634 }
 0x7ee   :  { %s525_s21 = smul.f32 %s635_s20, %s871_s14  ;;  %v535_v53 = vstv %s635_s20 }
 0x7ef   :  { %v536_v55 = vmul.f32 %v535_v53, %v861_v27 }
 0x7f0   :  { %s526_s22 = scvt.f32.s32 %s525_s21  ;;  %s531_s25 = sand.u32 2147483647, %s525_s21 }
 0x7f1   :  { %s529_s1 = sand.u32 2147483648, %s525_s21  ;;  %p532_p3 = scmp.lt.f32.partialorder %s531_s25, 2.1474836e+09 }
 0x7f2   :  { %s527_s27 = scvt.s32.f32 %s526_s22 }
 0x7f4   :  { %s528_s29 = sand.u32 2147483647, %s527_s27 }
 0x7f5   :  { %s530_s30 = sor.u32 %s529_s1, %s528_s29 }
 0x7f6   :  { %s940_s30 = smov (!%p532_p3, %s530_s30), %s525_s21 }
 0x7f7   :  { %s534_s7 = ssub.f32 0.0, %s940_s30 }
 0x7f9   :  { %v537_v56 = vstv %s534_s7 }
 0x7fa   :  { %v538_v58 = vadd.f32 %v537_v56, %v536_v55 }
 0x7fc   :  { %v636_v59 = vround.rtne.f32 %v538_v58 }
 0x7fe   :  { %v540_v61 = vmax.f32 %v636_v59, 0.0 }
 0x800   :  { %v541_v62 = vmin.f32 %v540_v61, 255.0 }
 0x802   :  { %v542_v3 = vsub.f32 %v541_v62, %v537_v56 }
 0x804   :  { %v544_v4 = vmul.f32 %v542_v3, %v522_v46 }
 0x806   :  { %v549_v6 = vsel %vm548_vm12, %v861_v27, %v544_v4 }
 0x807   :  { %v550_v7 = vsel %vm367_vm8, %v549_v6, %v480_v5 }
 0x808   :  { %551 = vst.msk [vmem:[#allocation2] sm:$0x3] %vm369_vm9, %v550_v7 }
 0x809   :  { %670 = shalt.err (!%p667_p10)
}
 0x80a   :  { %s671_s10 = scalar_lea.hbm %s912_s5, 32 }
 0x80b   :  { %p672_p11 = scmp.ne.s32.totalorder %s912_s5, %s671_s10  ;;  %p675_p12 = scmp.lt.u32.totalorder %s671_s10, %s912_s5 }
 0x80d   :  { %p677_p13 = pnand %p675_p12, %p672_p11 }
 0x80f   :  { %680 = shalt.err (!%p677_p13)
}
 0x810   :  { %561 = dma.vmem_to_hbm [thread:$0]  %s559_s6, 32, %s912_s5, [#allocation3]  }
 0x811   :  { %681 = dma.done.wait [#allocation3], 32  }
 0x812   :  { %682 = vsyncadd [#allocation3], 4294967264 }
 0x813   :  { %565 = vsyncpa [#allocation3], 1 }

</bundles_post_ra>
